<compile_context>
chip_gen: v7x
topology: tpu7x:2x2x1
jax: 0.10.0
libtpu: 0.0.40
codegen_flags: <defaults>
</compile_context>

<pallas_src>
import jax
import jax.numpy as jnp
import numpy as np
from jax.experimental import pallas as pl
from jax.experimental.pallas import tpu as pltpu

OUT_PAD = 128  # lane-dense output width (>= 128 -> unmasked vector stores)


def ppo_policy_kernel(x_ref, w1_ref, b1_ref, w2_ref, b2_ref, w3_ref, b3_ref,
                      o_ref):
    """Fused 3-layer MLP forward on one (TM, input_dim) batch tile.

    x / weights are bf16 (HBM-halved streams); all MXU matmuls accumulate in
    f32; bias add + ReLU run in f32 on the VPU.
    """
    # Layer 1: Linear(input_dim, 128) + ReLU
    h1 = jnp.dot(x_ref[...], w1_ref[...], preferred_element_type=jnp.float32)
    h1 = jnp.maximum(h1 + b1_ref[...], 0.0)

    # Layer 2: Linear(128, 64) + ReLU
    h2 = jnp.dot(h1.astype(jnp.bfloat16), w2_ref[...],
                 preferred_element_type=jnp.float32)
    h2 = jnp.maximum(h2 + b2_ref[...], 0.0)

    # Layer 3: Linear(64, OUT_PAD) logits (padded columns are exact zeros+0 bias)
    logits = jnp.dot(h2.astype(jnp.bfloat16), w3_ref[...],
                     preferred_element_type=jnp.float32)
    o_ref[...] = (logits + b3_ref[...]).astype(o_ref.dtype)


def ppo_policy_forward(x, params, *, tm=1024):
    """Batch-tiled fused MLP forward.

    tm: target rows per grid step (large tile amortizes the ~0.35 us per-step
    overhead; at input_dim=32 / hidden=128 the biggest per-tile intermediate is
    tm*128*4B, comfortably inside scoped VMEM even on v7x with double
    buffering).
    """
    w1, b1, w2, b2, w3, b3 = params
    B, input_dim = x.shape
    num_subgoals = w3.shape[1]

    # --- Lane-dense output: zero-pad the last layer to OUT_PAD columns. ---
    w3p = jnp.zeros((w3.shape[0], OUT_PAD), w3.dtype).at[:, :num_subgoals].set(w3)
    b3p = jnp.zeros((1, OUT_PAD), b3.dtype).at[:, :num_subgoals].set(b3)

    # --- bf16 for the HBM-streamed operands; biases stay f32 (epilogue). ---
    xb = x.astype(jnp.bfloat16)
    w1b = w1.astype(jnp.bfloat16)
    w2b = w2.astype(jnp.bfloat16)
    w3b = w3p.astype(jnp.bfloat16)
    b1f = b1.astype(jnp.float32)
    b2f = b2.astype(jnp.float32)
    b3f = b3p.astype(jnp.float32)

    # --- Batch tiling: tile rows, pad batch to a multiple of the tile. ---
    tm_eff = min(tm, ((B + 7) // 8) * 8)          # sublane-aligned tile
    b_pad = pl.cdiv(B, tm_eff) * tm_eff
    if b_pad != B:
        xb = jnp.pad(xb, ((0, b_pad - B), (0, 0)))
    grid = (b_pad // tm_eff,)

    def full_spec(shape):
        # Whole-array block, constant index_map -> stays VMEM-resident across
        # grid steps (no per-step weight re-DMA).
        return pl.BlockSpec(shape, lambda i: (0, 0))

    out = pl.pallas_call(
        ppo_policy_kernel,
        out_shape=jax.ShapeDtypeStruct((b_pad, OUT_PAD), jnp.float32),
        grid=grid,
        in_specs=[
            pl.BlockSpec((tm_eff, input_dim), lambda i: (i, 0)),  # x (streamed)
            full_spec(w1b.shape), full_spec(b1f.shape),
            full_spec(w2b.shape), full_spec(b2f.shape),
            full_spec(w3b.shape), full_spec(b3f.shape),
        ],
        out_specs=pl.BlockSpec((tm_eff, OUT_PAD), lambda i: (i, 0)),
        compiler_params=pltpu.CompilerParams(
            dimension_semantics=("parallel",)),   # megacore batch sharding (v7x)
    )(xb, w1b, b1f, w2b, b2f, w3b, b3f)

    return out[:B, :num_subgoals]


def init_params(key, input_dim, num_subgoals):
    """Deterministic init mimicking torch.nn.Linear default
    (U[-1/sqrt(fan_in), 1/sqrt(fan_in)]). Weights stored as (in, out)."""
    dims = [(input_dim, 128), (128, 64), (64, num_subgoals)]
    params = []
    for fan_in, fan_out in dims:
        key, kw, kb = jax.random.split(key, 3)
        bound = 1.0 / np.sqrt(fan_in)
        w = jax.random.uniform(kw, (fan_in, fan_out), jnp.float32, -bound, bound)
        b = jax.random.uniform(kb, (1, fan_out), jnp.float32, -bound, bound)
        params += [w, b]
    return tuple(params)


def reference_forward(x, params):
    """Pure-JAX reference with the same bf16-input / f32-accumulate recipe."""
    w1, b1, w2, b2, w3, b3 = params
    xb = x.astype(jnp.bfloat16)
    w1b, w2b, w3b = (w.astype(jnp.bfloat16) for w in (w1, w2, w3))
    h1 = jnp.maximum(
        jnp.dot(xb, w1b, preferred_element_type=jnp.float32) + b1, 0.0)
    h2 = jnp.maximum(
        jnp.dot(h1.astype(jnp.bfloat16), w2b,
                preferred_element_type=jnp.float32) + b2, 0.0)
    return jnp.dot(h2.astype(jnp.bfloat16), w3b,
                   preferred_element_type=jnp.float32) + b3


if __name__ == "__main__":
    key = jax.random.PRNGKey(0)

    batch = 2          # NOTE: at B~2 the kernel is launch-latency bound; the
    input_dim = 32     # tiling/pipelining pays off at B in the 100s-1000s.
    num_subgoals = 8

    key, kx = jax.random.split(key)
    x = jax.random.normal(kx, (batch, input_dim), dtype=jnp.float32)
    params = init_params(key, input_dim, num_subgoals)

    out = ppo_policy_forward(x, params)
    out = jax.block_until_ready(out)

    ref = reference_forward(x, params)
    np.testing.assert_allclose(np.asarray(out), np.asarray(ref),
                               rtol=1e-3, atol=1e-3)

    print("KERNEL_OK")
</pallas_src>

<mosaic_0001>
module attributes {stable_mosaic.version = 11 : i64} {
  func.func @ppo_policy_kernel(%arg0: i32, %arg1: memref<8x32xbf16, #tpu.memory_space<vmem>>, %arg2: memref<32x128xbf16, #tpu.memory_space<vmem>>, %arg3: memref<1x128xf32, #tpu.memory_space<vmem>>, %arg4: memref<128x64xbf16, #tpu.memory_space<vmem>>, %arg5: memref<1x64xf32, #tpu.memory_space<vmem>>, %arg6: memref<64x128xbf16, #tpu.memory_space<vmem>>, %arg7: memref<1x128xf32, #tpu.memory_space<vmem>>, %arg8: memref<8x128xf32, #tpu.memory_space<vmem>>) attributes {dimension_semantics = [#tpu.dimension_semantics<parallel>], iteration_bounds = array<i64: 1>, scalar_prefetch = 0 : i64, scratch_operands = 0 : i64, tpu.core_type = #tpu.core_type<tc>, window_params = [{transform_indices = @transform_0, window_bounds = array<i64: 8, 32>}, {pipeline_mode = #tpu.pipeline_mode<synchronous>, transform_indices = @transform_1, window_bounds = array<i64: 32, 128>}, {pipeline_mode = #tpu.pipeline_mode<synchronous>, transform_indices = @transform_2, window_bounds = array<i64: 1, 128>}, {pipeline_mode = #tpu.pipeline_mode<synchronous>, transform_indices = @transform_3, window_bounds = array<i64: 128, 64>}, {pipeline_mode = #tpu.pipeline_mode<synchronous>, transform_indices = @transform_4, window_bounds = array<i64: 1, 64>}, {pipeline_mode = #tpu.pipeline_mode<synchronous>, transform_indices = @transform_5, window_bounds = array<i64: 64, 128>}, {pipeline_mode = #tpu.pipeline_mode<synchronous>, transform_indices = @transform_6, window_bounds = array<i64: 1, 128>}, {transform_indices = @transform_7, window_bounds = array<i64: 8, 128>}]} {
    %c0 = arith.constant 0 : index
    %c0_0 = arith.constant 0 : index
    %0 = vector.load %arg1[%c0, %c0_0] : memref<8x32xbf16, #tpu.memory_space<vmem>>, vector<8x32xbf16>
    %c0_1 = arith.constant 0 : index
    %c0_2 = arith.constant 0 : index
    %1 = vector.load %arg2[%c0_1, %c0_2] : memref<32x128xbf16, #tpu.memory_space<vmem>>, vector<32x128xbf16>
    %cst = arith.constant dense<0.000000e+00> : vector<8x128xf32>
    %2 = tpu.matmul %0, %1, %cst {dimension_numbers = #tpu.dot_dimension_numbers<[1], [0], [0], [1], [0, 0, 1, 1], [], []>} : vector<8x32xbf16>, vector<32x128xbf16>, vector<8x128xf32> -> vector<8x128xf32>
    %c0_3 = arith.constant 0 : index
    %c0_4 = arith.constant 0 : index
    %3 = vector.load %arg3[%c0_3, %c0_4] : memref<1x128xf32, #tpu.memory_space<vmem>>, vector<1x128xf32>
    %4 = vector.broadcast %3 : vector<1x128xf32> to vector<8x128xf32>
    %5 = arith.addf %2, %4 : vector<8x128xf32>
    %cst_5 = arith.constant 0.000000e+00 : f32
    %6 = vector.broadcast %cst_5 : f32 to vector<8x128xf32>
    %7 = arith.maximumf %5, %6 : vector<8x128xf32>
    %8 = arith.truncf %7 : vector<8x128xf32> to vector<8x128xbf16>
    %c0_6 = arith.constant 0 : index
    %c0_7 = arith.constant 0 : index
    %9 = vector.load %arg4[%c0_6, %c0_7] : memref<128x64xbf16, #tpu.memory_space<vmem>>, vector<128x64xbf16>
    %cst_8 = arith.constant dense<0.000000e+00> : vector<8x64xf32>
    %10 = tpu.matmul %8, %9, %cst_8 {dimension_numbers = #tpu.dot_dimension_numbers<[1], [0], [0], [1], [0, 0, 1, 1], [], []>} : vector<8x128xbf16>, vector<128x64xbf16>, vector<8x64xf32> -> vector<8x64xf32>
    %c0_9 = arith.constant 0 : index
    %c0_10 = arith.constant 0 : index
    %11 = vector.load %arg5[%c0_9, %c0_10] : memref<1x64xf32, #tpu.memory_space<vmem>>, vector<1x64xf32>
    %12 = vector.broadcast %11 : vector<1x64xf32> to vector<8x64xf32>
    %13 = arith.addf %10, %12 : vector<8x64xf32>
    %cst_11 = arith.constant 0.000000e+00 : f32
    %14 = vector.broadcast %cst_11 : f32 to vector<8x64xf32>
    %15 = arith.maximumf %13, %14 : vector<8x64xf32>
    %16 = arith.truncf %15 : vector<8x64xf32> to vector<8x64xbf16>
    %c0_12 = arith.constant 0 : index
    %c0_13 = arith.constant 0 : index
    %17 = vector.load %arg6[%c0_12, %c0_13] : memref<64x128xbf16, #tpu.memory_space<vmem>>, vector<64x128xbf16>
    %cst_14 = arith.constant dense<0.000000e+00> : vector<8x128xf32>
    %18 = tpu.matmul %16, %17, %cst_14 {dimension_numbers = #tpu.dot_dimension_numbers<[1], [0], [0], [1], [0, 0, 1, 1], [], []>} : vector<8x64xbf16>, vector<64x128xbf16>, vector<8x128xf32> -> vector<8x128xf32>
    %c0_15 = arith.constant 0 : index
    %c0_16 = arith.constant 0 : index
    %19 = vector.load %arg7[%c0_15, %c0_16] : memref<1x128xf32, #tpu.memory_space<vmem>>, vector<1x128xf32>
    %20 = vector.broadcast %19 : vector<1x128xf32> to vector<8x128xf32>
    %21 = arith.addf %18, %20 : vector<8x128xf32>
    %c0_17 = arith.constant 0 : index
    %c0_18 = arith.constant 0 : index
    %22 = vector.load %arg8[%c0_17, %c0_18] : memref<8x128xf32, #tpu.memory_space<vmem>>, vector<8x128xf32>
    tpu.vector_store %arg8[%c0_17, %c0_18], %21 {strides = array<i32>} : memref<8x128xf32, #tpu.memory_space<vmem>>, vector<8x128xf32>,
    return
  }
  func.func @transform_0(%arg0: i32) -> (i32, i32) {
    %c0_i32 = arith.constant 0 : i32
    %c0_i32_0 = arith.constant 0 : i32
    return %arg0, %c0_i32 : i32, i32
  }
  func.func @transform_1(%arg0: i32) -> (i32, i32) {
    %c0_i32 = arith.constant 0 : i32
    %c0_i32_0 = arith.constant 0 : i32
    %c0_i32_1 = arith.constant 0 : i32
    return %c0_i32, %c0_i32_0 : i32, i32
  }
  func.func @transform_2(%arg0: i32) -> (i32, i32) {
    %c0_i32 = arith.constant 0 : i32
    %c0_i32_0 = arith.constant 0 : i32
    %c0_i32_1 = arith.constant 0 : i32
    return %c0_i32, %c0_i32_0 : i32, i32
  }
  func.func @transform_3(%arg0: i32) -> (i32, i32) {
    %c0_i32 = arith.constant 0 : i32
    %c0_i32_0 = arith.constant 0 : i32
    %c0_i32_1 = arith.constant 0 : i32
    return %c0_i32, %c0_i32_0 : i32, i32
  }
  func.func @transform_4(%arg0: i32) -> (i32, i32) {
    %c0_i32 = arith.constant 0 : i32
    %c0_i32_0 = arith.constant 0 : i32
    %c0_i32_1 = arith.constant 0 : i32
    return %c0_i32, %c0_i32_0 : i32, i32
  }
  func.func @transform_5(%arg0: i32) -> (i32, i32) {
    %c0_i32 = arith.constant 0 : i32
    %c0_i32_0 = arith.constant 0 : i32
    %c0_i32_1 = arith.constant 0 : i32
    return %c0_i32, %c0_i32_0 : i32, i32
  }
  func.func @transform_6(%arg0: i32) -> (i32, i32) {
    %c0_i32 = arith.constant 0 : i32
    %c0_i32_0 = arith.constant 0 : i32
    %c0_i32_1 = arith.constant 0 : i32
    return %c0_i32, %c0_i32_0 : i32, i32
  }
  func.func @transform_7(%arg0: i32) -> (i32, i32) {
    %c0_i32 = arith.constant 0 : i32
    %c0_i32_0 = arith.constant 0 : i32
    return %arg0, %c0_i32 : i32, i32
  }
}

</mosaic_0001>

<bundles_post_ra>
// kernel: tpu_custom_call.1
= control target key start
LH: loop header
LB: loop body
LE: loop exit
PB: predicated region body
PF: predicated region fallthrough
CT: control target
= control target key end

     0   :  { %v426_v1 = vmov 0.0   ;;  %vm427_vm0 = vmmov 0   ;;  %vm52_vm1 = vcmask 261120   ;;  %s538_s0 = inlined_call_operand.vmem [shape: bf16[8,32], index: 0, kind: input, shape index: {}]   ;;  %s539_s1 = inlined_call_operand.vmem [shape: bf16[32,128], index: 1, kind: input, shape index: {}]   ;;  %s540_s2 = inlined_call_operand.vmem [shape: f32[1,128], index: 2, kind: input, shape index: {}]   ;;  %s541_s3 = inlined_call_operand.vmem [shape: bf16[128,64], index: 3, kind: input, shape index: {}]   ;;  %s542_s4 = inlined_call_operand.vmem [shape: f32[1,64], index: 4, kind: input, shape index: {}]   ;;  %s543_s5 = inlined_call_operand.vmem [shape: bf16[64,128], index: 5, kind: input, shape index: {}]   ;;  %s544_s6 = inlined_call_operand.vmem [shape: f32[1,128], index: 6, kind: input, shape index: {}]   ;;  %s545_s7 = inlined_call_operand.hbm [shape: f32[8,128], index: 7, kind: output, shape index: {}]  }
   0x1   :  { %v388_v0 = vld [vmem:[%s539_s1] sm:$0xff]   ;;  %345 = vmatprep.subr.bf16.mxu0 %v426_v1  ;;  %353 = vmatprep.subr.bf16.mxu1 %v426_v1  ;;  %v389_v2 = vld [vmem:[%s539_s1 + $0x8] sm:$0xff]   ;;  %v392_v6 = vld [vmem:[%s541_s3 + $0x10] sm:$0xff]  }
   0x2   :  { %346 = vmatpush3.bf16.msra.mxu0 %v388_v0  ;;  %349 = vmatprep.mubr.msk.bf16.mxu0 %vm427_vm0, %v426_v1  ;;  %v390_v3 = vld [vmem:[%s541_s3] sm:$0xff]   ;;  %v391_v4 = vld [vmem:[%s541_s3 + $0x8] sm:$0xff]   ;;  %v393_v7 = vld [vmem:[%s541_s3 + $0x18] sm:$0xff]  }
   0x3   :  { %347 = vmatprep.subr.bf16.mxu0 %v426_v1  ;;  %369 = vmatprep.mubr.msk.bf16.mxu1 %vm427_vm0, %v426_v1  ;;  %v28_v5 = vld [vmem:[%s538_s0] sm:$0xf] }
   0x4   :  { %354 = vmatpush3.bf16.msra.mxu1 %v390_v3 }
   0x5   :  { %355 = vmatprep.subr.bf16.mxu1 %v426_v1 }
   0x6   :  { %348 = vmatpush3.bf16.msra.mxu0 %v389_v2 }
   0x7   :  { %373 = vmatprep.subr.bf16.mxu0 %v426_v1 }
   0x8   :  { %356 = vmatpush3.bf16.msra.mxu1 %v391_v4 }
   0x9   :  { %350 = vmatmul.mubr.msk.bf16.vlgmr.msra.gmra.mrb[0].mxu0 %vm52_vm1, %v28_v5  ;;  %357 = vmatprep.subr.bf16.mxu1 %v426_v1 }
   0xa   :  { %381 = vmatprep.mubr.msk.bf16.mxu0 %vm427_vm0, %v426_v1 }
   0xc   :  { %358 = vmatpush3.bf16.msra.mxu1 %v392_v6 }
   0xd   :  { %12 = vsyncpa [#allocation3], 0  ;;  %359 = vmatprep.subr.bf16.mxu1 %v426_v1  ;;  %v394_v8 = vld [vmem:[%s541_s3 + $0x20] sm:$0xff]   ;;  %v395_v9 = vld [vmem:[%s541_s3 + $0x28] sm:$0xff]   ;;  %vm250_vm2 = vcmask 523264   ;;  %s428_s10 = smov [#allocation2]  }
   0xe   :  { %v396_v10 = vld [vmem:[%s541_s3 + $0x30] sm:$0xff]   ;;  %v397_v11 = vld [vmem:[%s541_s3 + $0x38] sm:$0xff]   ;;  %v398_v12 = vld [vmem:[%s543_s5] sm:$0xff]  }
   0xf   :  { %374 = vmatpush3.bf16.msra.mxu0 %v398_v12  ;;  %v399_v13 = vld [vmem:[%s543_s5 + $0x8] sm:$0xff]   ;;  %v309_v14 = vld [vmem:[%s540_s2] ss:$0 sm:$0xff]  ;;  %v400_v22 = vld [vmem:[%s543_s5 + $0x10] sm:$0xff]  }
  0x10   :  { %360 = vmatpush3.bf16.msra.mxu1 %v393_v7  ;;  %375 = vmatprep.subr.bf16.mxu0 %v426_v1  ;;  %v401_v23 = vld [vmem:[%s543_s5 + $0x18] sm:$0xff]   ;;  %v313_v24 = vld [vmem:[%s542_s4] ss:$0 sm:$0xff]  ;;  %s301_s5 = sshll.u32 %s428_s10, 4  ;;  %s302_s5 = int_to_ptr.vmem [resolvable:$true] %s301_s5 }
  0x11   :  { %361 = vmatprep.subr.bf16.mxu1 %v426_v1  ;;  %v322_v32 = vld [vmem:[%s544_s6] ss:$0 sm:$0xff]  ;;  %s402_s4 = scalar_lea.vmem %s302_s5, 128  ;;  %p407_p1 = scmp.lt.s32.totalorder %s302_s5, %s302_s5 }
  0x12   :  { %p403_p0 = scmp.ne.s32.totalorder %s302_s5, %s402_s4  ;;  %p408_p2 = scmp.lt.s32.totalorder %s402_s4, %s402_s4 }
  0x13   :  { %376 = vmatpush3.bf16.msra.mxu0 %v399_v13 }
  0x14   :  { %362 = vmatpush3.bf16.msra.mxu1 %v394_v8  ;;  %377 = vmatprep.subr.bf16.mxu0 %v426_v1  ;;  %p409_p3 = por %p408_p2, %p407_p1 }
  0x15   :  { %363 = vmatprep.subr.bf16.mxu1 %v426_v1 }
  0x16   :  { %p410_p4 = pnand %p409_p3, %p403_p0 }
  0x17   :  { %378 = vmatpush3.bf16.msra.mxu0 %v400_v22 }
  0x18   :  { %364 = vmatpush3.bf16.msra.mxu1 %v395_v9  ;;  %379 = vmatprep.subr.bf16.mxu0 %v426_v1 }
  0x19   :  { %365 = vmatprep.subr.bf16.mxu1 %v426_v1 }
  0x1b   :  { %380 = vmatpush3.bf16.msra.mxu0 %v401_v23 }
  0x1c   :  { %366 = vmatpush3.bf16.msra.mxu1 %v396_v10 }
  0x1d   :  { %367 = vmatprep.subr.bf16.mxu1 %v426_v1 }
  0x20   :  { %368 = vmatpush3.bf16.msra.mxu1 %v397_v11 }
  0xdc   :  { %v90_v15 = vpop.f32.mrb[0].mxu0 }
  0xdd   :  { %v91_v16 = vadd.f32 %v309_v14, %v90_v15  ;;  %v351_v17 = vpop.f32.mrb[1].mxu0 }
  0xde   :  { %v93_v18 = vpop.f32.mrb[2].mxu0 }
  0xdf   :  { %v96_v19 = vmax.f32 %v91_v16, 0.0  ;;  %v352_v20 = vpop.f32.mrb[3].mxu0 }
  0xe1   :  { %v97_v21 = vpack.c.bf16 %v96_v19, %v96_v19 }
  0xe3   :  { %370 = vmatmul.mubr.bf16.vlgmr.msra.gmra.mrb[0].mxu1 %v97_v21 }
 0x1b6   :  { %v203_v25 = vpop.f32.mrb[0].mxu1 }
 0x1b7   :  { %v204_v26 = vadd.f32 %v313_v24, %v203_v25  ;;  %v371_v27 = vpop.f32.mrb[1].mxu1 }
 0x1b8   :  { %v206_v28 = vpop.f32.mrb[2].mxu1 }
 0x1b9   :  { %v209_v29 = vmax.f32 %v204_v26, 0.0  ;;  %v372_v30 = vpop.f32.mrb[3].mxu1 }
 0x1bb   :  { %v210_v31 = vpack.c.bf16 %v209_v29, %v209_v29 }
 0x1bd   :  { %382 = vmatmul.mubr.msk.bf16.vlgmr.msra.gmra.mrb[4].mxu0 %vm250_vm2, %v210_v31 }
 0x290   :  { %v288_v33 = vpop.f32.mrb[4].mxu0 }
 0x291   :  { %v289_v34 = vadd.f32 %v322_v32, %v288_v33  ;;  %v383_v35 = vpop.f32.mrb[5].mxu0 }
 0x292   :  { %v291_v36 = vpop.f32.mrb[6].mxu0 }
 0x293   :  { %294 = vst [vmem:[#allocation2] sm:$0xff] %v289_v34  ;;  %v384_v37 = vpop.f32.mrb[7].mxu0 }
 0x294   :  { %413 = shalt.err (!%p410_p4)
}
 0x295   :  { %s414_s6 = scalar_lea.hbm %s545_s7, 128 }
 0x296   :  { %p415_p5 = scmp.ne.s32.totalorder %s545_s7, %s414_s6  ;;  %p418_p6 = scmp.lt.u32.totalorder %s414_s6, %s545_s7 }
 0x298   :  { %p420_p7 = pnand %p418_p6, %p415_p5 }
 0x29a   :  { %423 = shalt.err (!%p420_p7)
}
 0x29b   :  { %304 = dma.vmem_to_hbm [thread:$0]  %s302_s5, 128, %s545_s7, [#allocation3]  }
 0x29c   :  { %424 = dma.done.wait [#allocation3], 128  }
 0x29d   :  { %425 = vsyncadd [#allocation3], 4294967168 }
 0x29e   :  { %308 = vsyncpa [#allocation3], 1 }

</bundles_post_ra>
